<compile_context>
chip_gen: v5e
topology: v5e:2x2
jax: 0.10.0
libtpu: 0.0.40
codegen_flags: <defaults>
</compile_context>

<pallas_src>
import jax
import jax.numpy as jnp
from jax import lax
from jax.experimental import pallas as pl
from jax.experimental.pallas import tpu as pltpu


def _round_up(x, m):
    return (x + m - 1) // m * m


def _vmem_capacity_bytes():
    """Physical VMEM per TensorCore; conservative fallback = v7x (64 MiB)."""
    try:
        info = pltpu.get_tpu_info()
        cap = getattr(info, "vmem_capacity_bytes", None)
        if cap:
            return int(cap)
    except Exception:
        pass
    return 64 * 1024 * 1024


def _mlp_kernel(x_ref, w0_ref, b0_ref, wh_ref, bh_ref, wo_ref, bo_ref, o_ref):
    """One row tile (TM rows) through the whole MLP stack.

    Activations are kept lane-dense: features on sublanes, rows on the
    128-wide lane axis.  All accumulation / bias adds / ReLUs are float32.
    """
    cdt = w0_ref.dtype  # MXU input (compute) dtype: bf16 or f32

    # In-kernel cast of the streamed tile (rides on idle VPU slots) instead of
    # a separate XLA pass over x in HBM.
    x = x_ref[...].astype(cdt)                       # (TM, input_dim)

    # Layer 0: contract w0's dim 1 with x's dim 1 ("trans_b") so the result is
    # the lane-dense (hidden_dim, TM) intermediate without any wrapper-side
    # transpose of x.
    h = lax.dot_general(w0_ref[...], x, (((1,), (1,)), ((), ())),
                        preferred_element_type=jnp.float32)
    h = jnp.maximum(h + b0_ref[...], 0.0)

    # Remaining hidden layers (static unroll; weights stacked on axis 0).
    for i in range(wh_ref.shape[0]):
        h = jnp.dot(wh_ref[i], h.astype(cdt), preferred_element_type=jnp.float32)
        h = jnp.maximum(h + bh_ref[i], 0.0)

    # Output projection (no activation); lane-dense (output_dim, TM) store.
    out = jnp.dot(wo_ref[...], h.astype(cdt), preferred_element_type=jnp.float32)
    o_ref[...] = (out + bo_ref[...]).astype(o_ref.dtype)


def mlp_forward(x, params, *, tile_m=None, compute_dtype=jnp.bfloat16,
                return_transposed=False):
    """x: (batch, N_v, input_dim) f32 -> (batch, N_v, output_dim) f32.

    If return_transposed=True, returns the kernel-native lane-dense
    (output_dim, batch*N_v) array and skips the epilogue transpose.
    """
    w0, b0, wh, bh, wo, bo = params  # PyTorch orientation: W (out, in), b (out,)
    batch, n_v, input_dim = x.shape
    hidden_dim = w0.shape[0]
    output_dim = wo.shape[0]
    n_stack = wh.shape[0]
    assert n_stack >= 1, "hidden_layers must be >= 2"

    m = batch * n_v
    cb = jnp.dtype(compute_dtype).itemsize

    # ---- generation-aware VMEM budget -------------------------------------
    vmem_cap = _vmem_capacity_bytes() * 7 // 8        # 56 MiB on v7x, 112 MiB on v5e/v6e

    weight_elems = (hidden_dim * input_dim
                    + n_stack * hidden_dim * hidden_dim
                    + output_dim * hidden_dim)
    bias_bytes = (hidden_dim * (1 + n_stack) + output_dim) * 4
    # x2: Pallas double-buffers even constant-index blocks by default.
    resident_bytes = 2 * (weight_elems * cb + bias_bytes)

    # Per-row VMEM cost of a tile: double-buffered in/out tiles + live f32
    # activation + its bf16 copy for the next MXU input.
    per_row_bytes = (2 * max(8, input_dim) * 4
                     + 2 * max(8, output_dim) * 4
                     + 2 * hidden_dim * 4)

    # ---- row tile selection ------------------------------------------------
    if tile_m is None:
        tile_m = 4096 if hidden_dim <= 256 else 1024   # amortize ~0.35us/step
    tile_m = _round_up(max(128, tile_m), 128)
    # Keep >=2 grid steps when the problem allows it (v7x megacore + overlap).
    if m > 128:
        tile_m = min(tile_m, _round_up(-(-m // 2), 128))
    # Never (much) larger than the problem.
    tile_m = min(tile_m, _round_up(m, 128))
    # Clamp by VMEM budget (weights resident + pipeline buffers).
    avail = vmem_cap - resident_bytes - (4 << 20)
    if avail > 0:
        tile_m = min(tile_m, max(128, (avail // per_row_bytes) // 128 * 128))
    tile_m = max(128, tile_m)

    m_pad = _round_up(m, tile_m)
    grid = (m_pad // tile_m,)

    # ---- operand prep (no transpose / cast passes over x) ------------------
    x2 = x.reshape(m, input_dim)
    if m_pad != m:
        # Cheap relative to the kernel's own streaming; padded rows produce
        # garbage that is sliced off below (no lane-axis reductions inside).
        x2 = jnp.pad(x2, ((0, m_pad - m), (0, 0)))

    w0c = w0.astype(compute_dtype)
    whc = wh.astype(compute_dtype)
    woc = wo.astype(compute_dtype)
    # Biases stay f32 (adds/ReLU happen in f32 accumulation space).
    b0c = b0.reshape(hidden_dim, 1).astype(jnp.float32)
    bhc = bh.reshape(n_stack, hidden_dim, 1).astype(jnp.float32)
    boc = bo.reshape(output_dim, 1).astype(jnp.float32)

    est = resident_bytes + tile_m * per_row_bytes
    vmem_limit = int(min(max(32 * 1024 * 1024, 2 * est), vmem_cap))

    out_t = pl.pallas_call(
        _mlp_kernel,
        out_shape=jax.ShapeDtypeStruct((output_dim, m_pad), jnp.float32),
        grid_spec=pltpu.PrefetchScalarGridSpec(
            num_scalar_prefetch=0,
            grid=grid,
            in_specs=[
                # streamed row tile of x in its natural (rows, features) layout
                pl.BlockSpec((tile_m, input_dim), lambda i: (i, 0)),
                # weights / biases: full arrays, resident in VMEM
                pl.BlockSpec((hidden_dim, input_dim), lambda i: (0, 0)),
                pl.BlockSpec((hidden_dim, 1), lambda i: (0, 0)),
                pl.BlockSpec((n_stack, hidden_dim, hidden_dim), lambda i: (0, 0, 0)),
                pl.BlockSpec((n_stack, hidden_dim, 1), lambda i: (0, 0, 0)),
                pl.BlockSpec((output_dim, hidden_dim), lambda i: (0, 0)),
                pl.BlockSpec((output_dim, 1), lambda i: (0, 0)),
            ],
            out_specs=pl.BlockSpec((output_dim, tile_m), lambda i: (0, i)),
        ),
        compiler_params=pltpu.CompilerParams(
            dimension_semantics=("parallel",),
            vmem_limit_bytes=vmem_limit,
        ),
    )(x2, w0c, b0c, whc, bhc, woc, boc)

    if return_transposed:
        return out_t[:, :m]                      # (output_dim, m), no epilogue pass
    # Drop row padding and restore (batch, N_v, output_dim) module semantics.
    return out_t[:, :m].T.reshape(batch, n_v, output_dim)


def init_mlp_params(key, input_dim, output_dim, hidden_dim, hidden_layers):
    """Deterministic init mimicking nn.Linear's uniform(-1/sqrt(fan_in), +).

    Weights are stored in PyTorch-native (out_features, in_features) layout.
    """
    ks = jax.random.split(key, 6)

    def uni(k, shape, fan_in):
        bound = 1.0 / jnp.sqrt(jnp.float32(fan_in))
        return jax.random.uniform(k, shape, jnp.float32, -bound, bound)

    w0 = uni(ks[0], (hidden_dim, input_dim), input_dim)
    b0 = uni(ks[1], (hidden_dim,), input_dim)
    wh = uni(ks[2], (hidden_layers - 1, hidden_dim, hidden_dim), hidden_dim)
    bh = uni(ks[3], (hidden_layers - 1, hidden_dim), hidden_dim)
    wo = uni(ks[4], (output_dim, hidden_dim), hidden_dim)
    bo = uni(ks[5], (output_dim,), hidden_dim)
    return (w0, b0, wh, bh, wo, bo)


def mlp_reference(x, params):
    """Pure-JAX f32 reference matching the PyTorch forward exactly."""
    w0, b0, wh, bh, wo, bo = params
    batch, n_v, _ = x.shape
    h = x.reshape(batch * n_v, -1)
    h = jnp.maximum(h @ w0.T + b0, 0.0)
    for i in range(wh.shape[0]):
        h = jnp.maximum(h @ wh[i].T + bh[i], 0.0)
    out = h @ wo.T + bo
    return out.reshape(batch, n_v, -1)


if __name__ == "__main__":
    input_dim, output_dim = 4, 3
    hidden_dim, hidden_layers = 32, 4

    key = jax.random.PRNGKey(0)
    k_x, k_p, k_x2 = jax.random.split(key, 3)
    params = init_mlp_params(k_p, input_dim, output_dim, hidden_dim, hidden_layers)

    # --- small shapes consistent with the module's forward ------------------
    batch, n_v = 2, 8            # batch*N_v = 16 rows
    x = jax.random.normal(k_x, (batch, n_v, input_dim), dtype=jnp.float32)
    ref = mlp_reference(x, params)

    # f32 compute path: bit-accurate check against the reference.
    out_f32 = jax.block_until_ready(
        mlp_forward(x, params, compute_dtype=jnp.float32))
    assert out_f32.shape == (batch, n_v, output_dim)
    assert jnp.allclose(out_f32, ref, atol=1e-5, rtol=1e-5), "f32 mismatch vs reference"

    # Default bf16-MXU path (f32 accumulation): relaxed tolerance.
    out_bf16 = jax.block_until_ready(mlp_forward(x, params))
    assert out_bf16.shape == (batch, n_v, output_dim)
    assert jnp.allclose(out_bf16, ref, atol=5e-2, rtol=5e-2), "bf16 mismatch vs reference"

    # --- second shape: exercises row padding + a multi-step grid -----------
    batch2, n_v2 = 2, 300        # m = 600 -> >=2 grid steps, padded last tile
    x2 = jax.random.normal(k_x2, (batch2, n_v2, input_dim), dtype=jnp.float32)
    ref2 = mlp_reference(x2, params)
    out2 = jax.block_until_ready(
        mlp_forward(x2, params, compute_dtype=jnp.float32))
    assert out2.shape == (batch2, n_v2, output_dim)
    assert jnp.allclose(out2, ref2, atol=1e-5, rtol=1e-5), "multi-tile mismatch"

    print("KERNEL_OK")
</pallas_src>

<mosaic_0001>
module attributes {stable_mosaic.version = 11 : i64} {
  func.func @_mlp_kernel(%arg0: i32, %arg1: memref<128x4xf32, #tpu.memory_space<vmem>>, %arg2: memref<32x4xf32, #tpu.memory_space<vmem>>, %arg3: memref<32x1xf32, #tpu.memory_space<vmem>>, %arg4: memref<3x32x32xf32, #tpu.memory_space<vmem>>, %arg5: memref<3x32x1xf32, #tpu.memory_space<vmem>>, %arg6: memref<3x32xf32, #tpu.memory_space<vmem>>, %arg7: memref<3x1xf32, #tpu.memory_space<vmem>>, %arg8: memref<3x128xf32, #tpu.memory_space<vmem>>) attributes {dimension_semantics = [#tpu.dimension_semantics<parallel>], iteration_bounds = array<i64: 1>, scalar_prefetch = 0 : i64, scratch_operands = 0 : i64, tpu.core_type = #tpu.core_type<tc>, window_params = [{transform_indices = @transform_0, window_bounds = array<i64: 128, 4>}, {pipeline_mode = #tpu.pipeline_mode<synchronous>, transform_indices = @transform_1, window_bounds = array<i64: 32, 4>}, {pipeline_mode = #tpu.pipeline_mode<synchronous>, transform_indices = @transform_2, window_bounds = array<i64: 32, 1>}, {pipeline_mode = #tpu.pipeline_mode<synchronous>, transform_indices = @transform_3, window_bounds = array<i64: 3, 32, 32>}, {pipeline_mode = #tpu.pipeline_mode<synchronous>, transform_indices = @transform_4, window_bounds = array<i64: 3, 32, 1>}, {pipeline_mode = #tpu.pipeline_mode<synchronous>, transform_indices = @transform_5, window_bounds = array<i64: 3, 32>}, {pipeline_mode = #tpu.pipeline_mode<synchronous>, transform_indices = @transform_6, window_bounds = array<i64: 3, 1>}, {transform_indices = @transform_7, window_bounds = array<i64: 3, 128>}]} {
    %c0 = arith.constant 0 : index
    %c0_0 = arith.constant 0 : index
    %0 = vector.load %arg1[%c0, %c0_0] : memref<128x4xf32, #tpu.memory_space<vmem>>, vector<128x4xf32>
    %c0_1 = arith.constant 0 : index
    %c0_2 = arith.constant 0 : index
    %1 = vector.load %arg2[%c0_1, %c0_2] : memref<32x4xf32, #tpu.memory_space<vmem>>, vector<32x4xf32>
    %cst = arith.constant dense<0.000000e+00> : vector<32x128xf32>
    %2 = tpu.matmul %1, %0, %cst {dimension_numbers = #tpu.dot_dimension_numbers<[1], [1], [0], [0], [0, 0, 1, 0], [], []>} : vector<32x4xf32>, vector<128x4xf32>, vector<32x128xf32> -> vector<32x128xf32>
    %c0_3 = arith.constant 0 : index
    %c0_4 = arith.constant 0 : index
    %3 = vector.load %arg3[%c0_3, %c0_4] : memref<32x1xf32, #tpu.memory_space<vmem>>, vector<32x1xf32>
    %4 = vector.broadcast %3 : vector<32x1xf32> to vector<32x128xf32>
    %5 = arith.addf %2, %4 : vector<32x128xf32>
    %cst_5 = arith.constant 0.000000e+00 : f32
    %6 = vector.broadcast %cst_5 : f32 to vector<32x128xf32>
    %7 = arith.maximumf %5, %6 : vector<32x128xf32>
    %c0_6 = arith.constant 0 : index
    %c0_7 = arith.constant 0 : index
    %c0_8 = arith.constant 0 : index
    %8 = vector.load %arg4[%c0_6, %c0_7, %c0_8] : memref<3x32x32xf32, #tpu.memory_space<vmem>>, vector<1x32x32xf32>
    %9 = vector.shape_cast %8 : vector<1x32x32xf32> to vector<32x32xf32>
    %cst_9 = arith.constant dense<0.000000e+00> : vector<32x128xf32>
    %10 = tpu.matmul %9, %7, %cst_9 {dimension_numbers = #tpu.dot_dimension_numbers<[1], [0], [0], [1], [0, 0, 1, 1], [], []>} : vector<32x32xf32>, vector<32x128xf32>, vector<32x128xf32> -> vector<32x128xf32>
    %c0_10 = arith.constant 0 : index
    %c0_11 = arith.constant 0 : index
    %c0_12 = arith.constant 0 : index
    %11 = vector.load %arg5[%c0_10, %c0_11, %c0_12] : memref<3x32x1xf32, #tpu.memory_space<vmem>>, vector<1x32x1xf32>
    %12 = vector.shape_cast %11 : vector<1x32x1xf32> to vector<32x1xf32>
    %13 = vector.broadcast %12 : vector<32x1xf32> to vector<32x128xf32>
    %14 = arith.addf %10, %13 : vector<32x128xf32>
    %cst_13 = arith.constant 0.000000e+00 : f32
    %15 = vector.broadcast %cst_13 : f32 to vector<32x128xf32>
    %16 = arith.maximumf %14, %15 : vector<32x128xf32>
    %c1 = arith.constant 1 : index
    %c0_14 = arith.constant 0 : index
    %c0_15 = arith.constant 0 : index
    %17 = vector.load %arg4[%c1, %c0_14, %c0_15] : memref<3x32x32xf32, #tpu.memory_space<vmem>>, vector<1x32x32xf32>
    %18 = vector.shape_cast %17 : vector<1x32x32xf32> to vector<32x32xf32>
    %cst_16 = arith.constant dense<0.000000e+00> : vector<32x128xf32>
    %19 = tpu.matmul %18, %16, %cst_16 {dimension_numbers = #tpu.dot_dimension_numbers<[1], [0], [0], [1], [0, 0, 1, 1], [], []>} : vector<32x32xf32>, vector<32x128xf32>, vector<32x128xf32> -> vector<32x128xf32>
    %c1_17 = arith.constant 1 : index
    %c0_18 = arith.constant 0 : index
    %c0_19 = arith.constant 0 : index
    %20 = vector.load %arg5[%c1_17, %c0_18, %c0_19] : memref<3x32x1xf32, #tpu.memory_space<vmem>>, vector<1x32x1xf32>
    %21 = vector.shape_cast %20 : vector<1x32x1xf32> to vector<32x1xf32>
    %22 = vector.broadcast %21 : vector<32x1xf32> to vector<32x128xf32>
    %23 = arith.addf %19, %22 : vector<32x128xf32>
    %cst_20 = arith.constant 0.000000e+00 : f32
    %24 = vector.broadcast %cst_20 : f32 to vector<32x128xf32>
    %25 = arith.maximumf %23, %24 : vector<32x128xf32>
    %c2 = arith.constant 2 : index
    %c0_21 = arith.constant 0 : index
    %c0_22 = arith.constant 0 : index
    %26 = vector.load %arg4[%c2, %c0_21, %c0_22] : memref<3x32x32xf32, #tpu.memory_space<vmem>>, vector<1x32x32xf32>
    %27 = vector.shape_cast %26 : vector<1x32x32xf32> to vector<32x32xf32>
    %cst_23 = arith.constant dense<0.000000e+00> : vector<32x128xf32>
    %28 = tpu.matmul %27, %25, %cst_23 {dimension_numbers = #tpu.dot_dimension_numbers<[1], [0], [0], [1], [0, 0, 1, 1], [], []>} : vector<32x32xf32>, vector<32x128xf32>, vector<32x128xf32> -> vector<32x128xf32>
    %c2_24 = arith.constant 2 : index
    %c0_25 = arith.constant 0 : index
    %c0_26 = arith.constant 0 : index
    %29 = vector.load %arg5[%c2_24, %c0_25, %c0_26] : memref<3x32x1xf32, #tpu.memory_space<vmem>>, vector<1x32x1xf32>
    %30 = vector.shape_cast %29 : vector<1x32x1xf32> to vector<32x1xf32>
    %31 = vector.broadcast %30 : vector<32x1xf32> to vector<32x128xf32>
    %32 = arith.addf %28, %31 : vector<32x128xf32>
    %cst_27 = arith.constant 0.000000e+00 : f32
    %33 = vector.broadcast %cst_27 : f32 to vector<32x128xf32>
    %34 = arith.maximumf %32, %33 : vector<32x128xf32>
    %c0_28 = arith.constant 0 : index
    %c0_29 = arith.constant 0 : index
    %35 = vector.load %arg6[%c0_28, %c0_29] : memref<3x32xf32, #tpu.memory_space<vmem>>, vector<3x32xf32>
    %cst_30 = arith.constant dense<0.000000e+00> : vector<3x128xf32>
    %36 = tpu.matmul %35, %34, %cst_30 {dimension_numbers = #tpu.dot_dimension_numbers<[1], [0], [0], [1], [0, 0, 1, 1], [], []>} : vector<3x32xf32>, vector<32x128xf32>, vector<3x128xf32> -> vector<3x128xf32>
    %c0_31 = arith.constant 0 : index
    %c0_32 = arith.constant 0 : index
    %37 = vector.load %arg7[%c0_31, %c0_32] : memref<3x1xf32, #tpu.memory_space<vmem>>, vector<3x1xf32>
    %38 = vector.broadcast %37 : vector<3x1xf32> to vector<3x128xf32>
    %39 = arith.addf %36, %38 : vector<3x128xf32>
    %c0_33 = arith.constant 0 : index
    %c0_34 = arith.constant 0 : index
    %40 = vector.load %arg8[%c0_33, %c0_34] : memref<3x128xf32, #tpu.memory_space<vmem>>, vector<3x128xf32>
    tpu.vector_store %arg8[%c0_33, %c0_34], %39 {strides = array<i32>} : memref<3x128xf32, #tpu.memory_space<vmem>>, vector<3x128xf32>,
    return
  }
  func.func @transform_0(%arg0: i32) -> (i32, i32) {
    %c0_i32 = arith.constant 0 : i32
    %c0_i32_0 = arith.constant 0 : i32
    return %arg0, %c0_i32 : i32, i32
  }
  func.func @transform_1(%arg0: i32) -> (i32, i32) {
    %c0_i32 = arith.constant 0 : i32
    %c0_i32_0 = arith.constant 0 : i32
    %c0_i32_1 = arith.constant 0 : i32
    return %c0_i32, %c0_i32_0 : i32, i32
  }
  func.func @transform_2(%arg0: i32) -> (i32, i32) {
    %c0_i32 = arith.constant 0 : i32
    %c0_i32_0 = arith.constant 0 : i32
    %c0_i32_1 = arith.constant 0 : i32
    return %c0_i32, %c0_i32_0 : i32, i32
  }
  func.func @transform_3(%arg0: i32) -> (i32, i32, i32) {
    %c0_i32 = arith.constant 0 : i32
    %c0_i32_0 = arith.constant 0 : i32
    %c0_i32_1 = arith.constant 0 : i32
    %c0_i32_2 = arith.constant 0 : i32
    return %c0_i32, %c0_i32_0, %c0_i32_1 : i32, i32, i32
  }
  func.func @transform_4(%arg0: i32) -> (i32, i32, i32) {
    %c0_i32 = arith.constant 0 : i32
    %c0_i32_0 = arith.constant 0 : i32
    %c0_i32_1 = arith.constant 0 : i32
    %c0_i32_2 = arith.constant 0 : i32
    return %c0_i32, %c0_i32_0, %c0_i32_1 : i32, i32, i32
  }
  func.func @transform_5(%arg0: i32) -> (i32, i32) {
    %c0_i32 = arith.constant 0 : i32
    %c0_i32_0 = arith.constant 0 : i32
    %c0_i32_1 = arith.constant 0 : i32
    return %c0_i32, %c0_i32_0 : i32, i32
  }
  func.func @transform_6(%arg0: i32) -> (i32, i32) {
    %c0_i32 = arith.constant 0 : i32
    %c0_i32_0 = arith.constant 0 : i32
    %c0_i32_1 = arith.constant 0 : i32
    return %c0_i32, %c0_i32_0 : i32, i32
  }
  func.func @transform_7(%arg0: i32) -> (i32, i32) {
    %c0_i32 = arith.constant 0 : i32
    %c0_i32_0 = arith.constant 0 : i32
    return %c0_i32, %arg0 : i32, i32
  }
}

</mosaic_0001>

<bundles_post_ra>
// kernel: tpu_custom_call.1
= control target key start
LH: loop header
LB: loop body
LE: loop exit
PB: predicated region body
PF: predicated region fallthrough
CT: control target
= control target key end

     0   :  { %vm71_vm0 = vcmask 31744   ;;  %s744_s0 = inlined_call_operand.vmem [shape: f32[128,4], index: 0, kind: input, shape index: {}]   ;;  %s745_s1 = inlined_call_operand.vmem [shape: f32[32,4], index: 1, kind: input, shape index: {}]   ;;  %s746_s2 = inlined_call_operand.vmem [shape: f32[32,1], index: 2, kind: input, shape index: {}]   ;;  %s747_s3 = inlined_call_operand.vmem [shape: f32[3,32,32], index: 3, kind: input, shape index: {}]   ;;  %s748_s4 = inlined_call_operand.vmem [shape: f32[3,32,1], index: 4, kind: input, shape index: {}]   ;;  %s749_s5 = inlined_call_operand.vmem [shape: f32[3,32], index: 5, kind: input, shape index: {}]   ;;  %s750_s6 = inlined_call_operand.vmem [shape: f32[3,1], index: 6, kind: input, shape index: {}]   ;;  %s751_s7 = inlined_call_operand.hbm [shape: f32[3,128], index: 7, kind: output, shape index: {}]  }
   0x1   :  { %v42_v0 = vld [vmem:[%s744_s0 + $0x78] sm:$0xff]  ;;  %v41_v1 = vld [vmem:[%s744_s0 + $0x70] sm:$0xff] }
   0x2   :  { %436 = vmatpush.xpose.msk.msra.mxu0 %vm71_vm0, %v42_v0 }
   0x3   :  { %12 = vsyncpa [#allocation3], 0  ;;  %v40_v2 = vld [vmem:[%s744_s0 + $0x68] sm:$0xff]  ;;  %v39_v3 = vld [vmem:[%s744_s0 + $0x60] sm:$0xff]  ;;  %v516_v7 = vmov 0   ;;  %vm193_vm1 = vcmask 261120  }
   0x4   :  { %v38_v4 = vld [vmem:[%s744_s0 + $0x58] sm:$0xff]  ;;  %v37_v6 = vld [vmem:[%s744_s0 + $0x50] sm:$0xff]  ;;  %487 = vset.pattern.permute.xlu0 %v516_v7  ;;  %488 = vset.pattern.permute.xlu1 %v516_v7  ;;  %v48_v8 = vld [vmem:[%s746_s2 + $0x8] sm:$0xff]  ;;  %s517_s21 = smov [#allocation2]   ;;  %s427_s25 = sshll.u32 %s751_s7, 4  ;;  %s428_s25 = int_to_ptr.hbm [resolvable:$true] %s427_s25 }
   0x5   :  { %v50_v5 = vld [vmem:[%s746_s2 + $0x18] sm:$0xff]  ;;  %489 = vset.pattern.permute.xlu2 %v516_v7  ;;  %v36_v9 = vld [vmem:[%s744_s0 + $0x48] sm:$0xff]  ;;  %58 = vperm.xlu1 %488, %v48_v8   ;;  %v49_v10 = vld [vmem:[%s746_s2 + $0x10] sm:$0xff]  ;;  %s425_s22 = sshll.u32 %s517_s21, 4  ;;  %s426_s22 = int_to_ptr.vmem [resolvable:$true] %s425_s22 }
   0x6   :  { %437 = vmatpush.xpose.msk.msra.mxu0 %vm71_vm0, %v41_v1  ;;  %68 = vperm.xlu0 %487, %v50_v5   ;;  %v35_v11 = vld [vmem:[%s744_s0 + $0x40] sm:$0xff]  ;;  %v34_v12 = vld [vmem:[%s744_s0 + $0x38] sm:$0xff]  ;;  %v170_v14 = vld [vmem:[%s748_s4 + $0x8] sm:$0xff] }
   0x7   :  { %v47_v13 = vld [vmem:[%s746_s2] sm:$0xff]  ;;  %v33_v15 = vld [vmem:[%s744_s0 + $0x30] sm:$0xff]  ;;  %v32_v16 = vld [vmem:[%s744_s0 + $0x28] sm:$0xff] }
   0x8   :  { %v169_v17 = vld [vmem:[%s748_s4] sm:$0xff]  ;;  %v466_v18 = vld [vmem:[%s748_s4 + $0x30] sm:$0xff]  ;;  %v30_v20 = vld [vmem:[%s744_s0 + $0x18] sm:$0xff] }
   0x9   :  { %v31_v19 = vld [vmem:[%s744_s0 + $0x20] sm:$0xff]  ;;  %v465_v21 = vld [vmem:[%s748_s4 + $0x28] sm:$0xff]  ;;  %v479_v22 = vld [vmem:[%s748_s4 + $0x58] sm:$0xff] }
   0xa   :  { %438 = vmatpush.xpose.msk.msra.mxu0 %vm71_vm0, %v40_v2  ;;  %v29_v23 = vld [vmem:[%s744_s0 + $0x10] sm:$0xff]  ;;  %v28_v24 = vld [vmem:[%s744_s0 + $0x8] sm:$0xff]  ;;  %v476_v26 = vld [vmem:[%s748_s4 + $0x40] sm:$0xff] }
   0xb   :  { %v478_v25 = vld [vmem:[%s748_s4 + $0x50] sm:$0xff]  ;;  %v27_v27 = vld [vmem:[%s744_s0] sm:$0xff]  ;;  %v44_v30 = vld [vmem:[%s745_s1 + $0x8] sm:$0xff] }
   0xc   :  { %v43_v28 = vld [vmem:[%s745_s1] sm:$0xff]  ;;  %v45_v31 = vld [vmem:[%s745_s1 + $0x10] sm:$0xff]  ;;  %v46_v32 = vld [vmem:[%s745_s1 + $0x18] sm:$0xff] }
   0xd   :  { %53 = vperm.xlu1 %488, %v47_v13   ;;  %v390_v29 = vld [vmem:[%s750_s6] sm:$0x7]  ;;  %v172_v38 = vld [vmem:[%s748_s4 + $0x18] sm:$0xff]  ;;  %v171_v46 = vld [vmem:[%s748_s4 + $0x10] sm:$0xff] }
   0xe   :  { %439 = vmatpush.xpose.msk.msra.mxu0 %vm71_vm0, %v39_v3  ;;  %63 = vperm.xlu0 %487, %v49_v10   ;;  %v165_v51 = vld [vmem:[%s747_s3] sm:$0xff]  ;;  %v467_v52 = vld [vmem:[%s748_s4 + $0x38] sm:$0xff]  ;;  %v166_v53 = vld [vmem:[%s747_s3 + $0x8] sm:$0xff] }
   0xf   :  { %190 = vperm.xlu2 %489, %v172_v38   ;;  %v464_v54 = vld [vmem:[%s748_s4 + $0x20] sm:$0xff]  ;;  %v167_v55 = vld [vmem:[%s747_s3 + $0x10] sm:$0xff]  ;;  %v477_v56 = vld [vmem:[%s748_s4 + $0x48] sm:$0xff] }
  0x10   :  { %v168_v57 = vld [vmem:[%s747_s3 + $0x18] sm:$0xff]  ;;  %v460_v10 = vld [vmem:[%s747_s3 + $0x20] sm:$0xff] }
  0x11   :  { %v463_v13 = vld [vmem:[%s747_s3 + $0x38] sm:$0xff] }
  0x12   :  { %440 = vmatpush.xpose.msk.msra.mxu0 %vm71_vm0, %v38_v4 }
  0x15   :  { %175 = vperm.xlu1 %488, %v169_v17  }
  0x16   :  { %441 = vmatpush.xpose.msk.msra.mxu0 %vm71_vm0, %v37_v6  ;;  %180 = vperm.xlu0 %487, %v170_v14  }
  0x17   :  { %185 = vperm.xlu2 %489, %v171_v46  }
  0x1a   :  { %442 = vmatpush.xpose.msk.msra.mxu0 %vm71_vm0, %v36_v9 }
  0x1d   :  { %256 = vperm.xlu1 %488, %v465_v21  }
  0x1e   :  { %443 = vmatpush.xpose.msk.msra.mxu0 %vm71_vm0, %v35_v11  ;;  %261 = vperm.xlu0 %487, %v466_v18   ;;  %v461_v11 = vld [vmem:[%s747_s3 + $0x28] sm:$0xff] }
  0x1f   :  { %266 = vperm.xlu2 %489, %v467_v52  }
  0x22   :  { %444 = vmatpush.xpose.msk.msra.mxu0 %vm71_vm0, %v34_v12  ;;  %v462_v12 = vld [vmem:[%s747_s3 + $0x30] sm:$0xff] }
  0x25   :  { %336 = vperm.xlu1 %488, %v478_v25  }
  0x26   :  { %445 = vmatpush.xpose.msk.msra.mxu0 %vm71_vm0, %v33_v15  ;;  %341 = vperm.xlu0 %487, %v479_v22  }
  0x27   :  { %251 = vperm.xlu2 %489, %v464_v54  }
  0x2a   :  { %446 = vmatpush.xpose.msk.msra.mxu0 %vm71_vm0, %v32_v16 }
  0x2d   :  { %393 = vperm.xlu1 %488, %v390_v29  }
  0x2e   :  { %447 = vmatpush.xpose.msk.msra.mxu0 %vm71_vm0, %v31_v19  ;;  %326 = vperm.xlu0 %487, %v476_v26  }
  0x2f   :  { %331 = vperm.xlu2 %489, %v477_v56  }
  0x32   :  { %448 = vmatpush.xpose.msk.msra.mxu0 %vm71_vm0, %v30_v20 }
  0x36   :  { %449 = vmatpush.xpose.msk.msra.mxu0 %vm71_vm0, %v29_v23 }
  0x3a   :  { %450 = vmatpush.xpose.msk.msra.mxu0 %vm71_vm0, %v28_v24 }
  0x3e   :  { %451 = vmatpush.xpose.msk.msra.mxu0 %vm71_vm0, %v27_v27 }
  0x41   :  { %452 = vmatmul.msk.f32.vlgmr.msra.gmra.mxu0 %vm71_vm0, %v43_v28 }
  0x49   :  { %453 = vmatmul.msk.f32.gmra.mxu0 %vm71_vm0, %v44_v30  ;;  %v472_v30 = vld [vmem:[%s747_s3 + $0x40] sm:$0xff] }
  0x51   :  { %454 = vmatmul.msk.f32.gmra.mxu0 %vm71_vm0, %v45_v31  ;;  %v473_v31 = vld [vmem:[%s747_s3 + $0x48] sm:$0xff] }
  0x59   :  { %455 = vmatmul.msk.f32.gmra.mxu0 %vm71_vm0, %v46_v32  ;;  %v474_v32 = vld [vmem:[%s747_s3 + $0x50] sm:$0xff] }
  0x69   :  { %v191_v60 = vpop.permute.xlu2 %190 }
  0x71   :  { %v186_v62 = vpop.permute.xlu2 %185 }
  0x77   :  { %v59_v37 = vpop.permute.xlu1 %58 }
  0x78   :  { %v69_v35 = vpop.permute.xlu0 %68 }
  0x79   :  { %v267_v17 = vpop.permute.xlu2 %266 }
  0x7f   :  { %v54_v45 = vpop.permute.xlu1 %53 }
  0x80   :  { %v64_v39 = vpop.permute.xlu0 %63 }
  0x81   :  { %v252_v25 = vpop.permute.xlu2 %251 }
  0x87   :  { %v176_v5 = vpop.permute.xlu1 %175 }
  0x88   :  { %v181_v2 = vpop.permute.xlu0 %180 }
  0x8f   :  { %v257_v22 = vpop.permute.xlu1 %256 }
  0x90   :  { %v262_v18 = vpop.permute.xlu0 %261 }
  0x97   :  { %v337_v38 = vpop.permute.xlu1 %336 }
  0xbe   :  { %v149_v33 = vpop.f32.mrf.mxu0 }
  0xbf   :  { %v150_v47 = vadd.f32 %v149_v33, %v54_v45  ;;  %v475_v33 = vld [vmem:[%s747_s3 + $0x58] sm:$0xff] }
  0xc1   :  { %v161_v50 = vmax.f32 %v150_v47, 0.0 }
  0xc6   :  { %v152_v34 = vpop.f32.mrf.mxu0 }
  0xc7   :  { %v153_v43 = vadd.f32 %v152_v34, %v59_v37  ;;  %v342_v37 = vpop.permute.xlu0 %341 }
  0xc9   :  { %v162_v49 = vmax.f32 %v153_v43, 0.0 }
  0xce   :  { %v155_v36 = vpop.f32.mrf.mxu0 }
  0xcf   :  { %v156_v41 = vadd.f32 %v155_v36, %v64_v39  ;;  %v327_v45 = vpop.permute.xlu0 %326 }
  0xd1   :  { %v163_v48 = vmax.f32 %v156_v41, 0.0 }
  0xd6   :  { %v158_v40 = vpop.f32.mrf.mxu0 }
  0xd7   :  { %v159_v42 = vadd.f32 %v158_v40, %v69_v35 }
  0xd9   :  { %v164_v44 = vmax.f32 %v159_v42, 0.0  ;;  %v332_v42 = vpop.permute.xlu2 %331 }
  0xdb   :  { %218 = vmatpush.msra.mxu1 %v164_v44 }
  0xdd   :  { %219 = vmatpush.msra.mxu1 %v163_v48 }
  0xdf   :  { %220 = vmatpush.msra.mxu1 %v162_v49 }
  0xe1   :  { %221 = vmatpush.msra.mxu1 %v161_v50  ;;  %v389_v50 = vld [vmem:[%s749_s5] sm:$0x7] }
  0xe2   :  { %456 = vmatmul.msk.f32.vlgmr.msra.gmra.mxu1 %vm193_vm1, %v165_v51  ;;  %v394_v51 = vpop.permute.xlu1 %393 }
  0xea   :  { %457 = vmatmul.msk.f32.gmra.mxu1 %vm193_vm1, %v166_v53 }
  0xf2   :  { %458 = vmatmul.msk.f32.gmra.mxu1 %vm193_vm1, %v167_v55 }
  0xfa   :  { %459 = vmatmul.msk.f32.gmra.mxu1 %vm193_vm1, %v168_v57 }
 0x15f   :  { %v223_v58 = vpop.f32.mrf.mxu1 }
 0x160   :  { %v224_v6 = vadd.f32 %v223_v58, %v176_v5 }
 0x162   :  { %v235_v9 = vmax.f32 %v224_v6, 0.0 }
 0x167   :  { %v226_v59 = vpop.f32.mrf.mxu1 }
 0x168   :  { %v227_v3 = vadd.f32 %v226_v59, %v181_v2 }
 0x16a   :  { %v236_v8 = vmax.f32 %v227_v3, 0.0 }
 0x16f   :  { %v229_v61 = vpop.f32.mrf.mxu1 }
 0x170   :  { %v230_v0 = vadd.f32 %v229_v61, %v186_v62 }
 0x172   :  { %v237_v7 = vmax.f32 %v230_v0, 0.0 }
 0x177   :  { %v232_v63 = vpop.f32.mrf.mxu1 }
 0x178   :  { %v233_v1 = vadd.f32 %v232_v63, %v191_v60 }
 0x17a   :  { %v238_v4 = vmax.f32 %v233_v1, 0.0 }
 0x17c   :  { %293 = vmatpush.msra.mxu2 %v238_v4 }
 0x17e   :  { %294 = vmatpush.msra.mxu2 %v237_v7 }
 0x180   :  { %295 = vmatpush.msra.mxu2 %v236_v8 }
 0x182   :  { %296 = vmatpush.msra.mxu2 %v235_v9 }
 0x183   :  { %468 = vmatmul.msk.f32.vlgmr.msra.gmra.mxu2 %vm193_vm1, %v460_v10 }
 0x18b   :  { %469 = vmatmul.msk.f32.gmra.mxu2 %vm193_vm1, %v461_v11 }
 0x193   :  { %470 = vmatmul.msk.f32.gmra.mxu2 %vm193_vm1, %v462_v12 }
 0x19b   :  { %471 = vmatmul.msk.f32.gmra.mxu2 %vm193_vm1, %v463_v13 }
 0x206   :  { %v298_v14 = vpop.f32.mrf.mxu2 }
 0x207   :  { %v299_v26 = vadd.f32 %v298_v14, %v252_v25 }
 0x209   :  { %v310_v29 = vmax.f32 %v299_v26, 0.0 }
 0x20e   :  { %v301_v15 = vpop.f32.mrf.mxu2 }
 0x20f   :  { %v302_v23 = vadd.f32 %v301_v15, %v257_v22 }
 0x211   :  { %v311_v28 = vmax.f32 %v302_v23, 0.0 }
 0x216   :  { %v304_v16 = vpop.f32.mrf.mxu2 }
 0x217   :  { %v305_v20 = vadd.f32 %v304_v16, %v262_v18 }
 0x219   :  { %v312_v27 = vmax.f32 %v305_v20, 0.0 }
 0x21e   :  { %v307_v19 = vpop.f32.mrf.mxu2 }
 0x21f   :  { %v308_v21 = vadd.f32 %v307_v19, %v267_v17 }
 0x221   :  { %v313_v24 = vmax.f32 %v308_v21, 0.0 }
 0x223   :  { %368 = vmatpush.msra.mxu3 %v313_v24 }
 0x225   :  { %369 = vmatpush.msra.mxu3 %v312_v27 }
 0x227   :  { %370 = vmatpush.msra.mxu3 %v311_v28 }
 0x229   :  { %371 = vmatpush.msra.mxu3 %v310_v29 }
 0x22a   :  { %480 = vmatmul.msk.f32.vlgmr.msra.gmra.mxu3 %vm193_vm1, %v472_v30 }
 0x232   :  { %481 = vmatmul.msk.f32.gmra.mxu3 %vm193_vm1, %v473_v31 }
 0x23a   :  { %482 = vmatmul.msk.f32.gmra.mxu3 %vm193_vm1, %v474_v32 }
 0x242   :  { %483 = vmatmul.msk.f32.gmra.mxu3 %vm193_vm1, %v475_v33 }
 0x2ad   :  { %v373_v34 = vpop.f32.mrf.mxu3 }
 0x2ae   :  { %v374_v46 = vadd.f32 %v373_v34, %v327_v45 }
 0x2b0   :  { %v385_v49 = vmax.f32 %v374_v46, 0.0 }
 0x2b5   :  { %v376_v35 = vpop.f32.mrf.mxu3 }
 0x2b6   :  { %v377_v43 = vadd.f32 %v376_v35, %v332_v42 }
 0x2b8   :  { %v386_v48 = vmax.f32 %v377_v43, 0.0 }
 0x2bd   :  { %v379_v36 = vpop.f32.mrf.mxu3 }
 0x2be   :  { %v380_v40 = vadd.f32 %v379_v36, %v337_v38 }
 0x2c0   :  { %v387_v47 = vmax.f32 %v380_v40, 0.0 }
 0x2c5   :  { %v382_v39 = vpop.f32.mrf.mxu3 }
 0x2c6   :  { %v383_v41 = vadd.f32 %v382_v39, %v342_v37 }
 0x2c8   :  { %v388_v44 = vmax.f32 %v383_v41, 0.0 }
 0x2ca   :  { %411 = vmatpush.msrb.mxu1 %v388_v44 }
 0x2cc   :  { %412 = vmatpush.msrb.mxu1 %v387_v47 }
 0x2ce   :  { %413 = vmatpush.msrb.mxu1 %v386_v48 }
 0x2d0   :  { %414 = vmatpush.msrb.mxu1 %v385_v49 }
 0x2d1   :  { %484 = vmatmul.msk.f32.vlgmr.msrb.gmra.mxu1 %vm193_vm1, %v389_v50 }
 0x34e   :  { %v416_v52 = vpop.f32.mrf.mxu1 }
 0x34f   :  { %v417_v53 = vadd.f32 %v416_v52, %v394_v51 }
 0x351   :  { %419 = vst [vmem:[#allocation2] sm:$0x7] %v417_v53 }
 0x352   :  { %430 = dma.vmem_to_hbm [thread:$0]  %s426_s22, 64, %s428_s25, [#allocation3]  }
 0x353   :  { %514 = dma.done.wait [#allocation3], 64  }
 0x354   :  { %515 = vsyncadd [#allocation3], 4294967232 }
 0x355   :  { %435 = vsyncpa [#allocation3], 1 }

</bundles_post_ra>
